<compile_context>
chip_gen: v6e
topology: v6e:2x2x1
jax: 0.10.0
libtpu: 0.0.40
codegen_flags: <defaults>
</compile_context>

<pallas_src>
import jax
import jax.numpy as jnp
from jax.experimental import pallas as pl
from jax.experimental.pallas import tpu as pltpu

LANES = 128  # lane tile (and padding granularity) for the sample axis


def mlp_kernel(x_ref, w1_ref, b1_ref, w2_ref, b2_ref, o_ref):
    # x_ref: (1, LANES) lane-dense samples; x/5 scaling already folded into w1.
    x = x_ref[...]
    # fc1 as an outer product on the VPU: (H,1)*(1,LANES) + (H,1) -> (H,LANES)
    h = w1_ref[...] * x + b1_ref[...]
    # activation on the EUP (free slot alongside the VPU work)
    h = jnp.tanh(h)
    # fc2 as a weighted sublane reduce on the XLU: sum over H rows -> (1,LANES)
    o = jnp.sum(h * w2_ref[...], axis=0, keepdims=True) + b2_ref[0, 0]
    o_ref[...] = o


def mlp_forward(x, w1, b1, w2, b2):
    """Forward pass of MLP(act=tanh, nlayer=H).

    x : (N, 1) float32
    w1: (H, 1) fc1.weight   b1: (H,) fc1.bias
    w2: (1, H) fc2.weight   b2: (1,) fc2.bias
    returns (N, 1) float32
    """
    N = x.shape[0]
    H = w1.shape[0]
    NPAD = pl.cdiv(N, LANES) * LANES

    # Lane-dense, padded input: samples on the 128-lane axis.
    x_l = jnp.zeros((1, NPAD), jnp.float32).at[0, :N].set(x[:, 0].astype(jnp.float32))

    # Fold the x/5 input scaling into the fc1 weight (trace-time, free).
    w1_l = (w1.reshape(H, 1) / 5.0).astype(jnp.float32)
    b1_l = b1.reshape(H, 1).astype(jnp.float32)
    w2_l = w2.reshape(H, 1).astype(jnp.float32)  # fc2.weight (1,H) -> (H,1)
    b2_l = b2.reshape(1, 1).astype(jnp.float32)  # scalar, lives in SMEM

    out = pl.pallas_call(
        mlp_kernel,
        out_shape=jax.ShapeDtypeStruct((1, NPAD), jnp.float32),
        grid=(NPAD // LANES,),
        in_specs=[
            pl.BlockSpec((1, LANES), lambda i: (0, i)),                  # x tile
            pl.BlockSpec((H, 1), lambda i: (0, 0)),                      # w1/5
            pl.BlockSpec((H, 1), lambda i: (0, 0)),                      # b1
            pl.BlockSpec((H, 1), lambda i: (0, 0)),                      # w2
            pl.BlockSpec(memory_space=pltpu.MemorySpace.SMEM),           # b2 scalar
        ],
        out_specs=pl.BlockSpec((1, LANES), lambda i: (0, i)),
        compiler_params=pltpu.CompilerParams(
            dimension_semantics=("parallel",),
        ),
    )(x_l, w1_l, b1_l, w2_l, b2_l)

    # Drop the padded lanes and restore the (N, 1) column layout.
    return out[0, :N].reshape(N, 1)


def mlp_reference(x, w1, b1, w2, b2):
    x = x / 5.0
    h = jnp.tanh(x @ w1.T + b1)
    return h @ w2.T + b2


if __name__ == "__main__":
    nlayer = 16
    N = 100  # matches torch.linspace(-2*pi, 2*pi, 100).view(-1, 1)

    key = jax.random.PRNGKey(0)
    k1, k2, k3, k4 = jax.random.split(key, 4)

    # Input: same role as the linspace x in the reference script.
    x = jnp.linspace(-2 * jnp.pi, 2 * jnp.pi, N, dtype=jnp.float32).reshape(-1, 1)

    # Deterministic parameter init, PyTorch nn.Linear shapes:
    #   fc1.weight (16,1), fc1.bias (16,), fc2.weight (1,16), fc2.bias (1,)
    bound1 = 1.0  # 1/sqrt(fan_in=1)
    w1 = jax.random.uniform(k1, (nlayer, 1), jnp.float32, -bound1, bound1)
    b1 = jax.random.uniform(k2, (nlayer,), jnp.float32, -bound1, bound1)
    bound2 = 1.0 / jnp.sqrt(float(nlayer))
    w2 = jax.random.uniform(k3, (1, nlayer), jnp.float32, -bound2, bound2)
    b2 = jax.random.uniform(k4, (1,), jnp.float32, -bound2, bound2)

    out = mlp_forward(x, w1, b1, w2, b2)
    out = jax.block_until_ready(out)

    ref = mlp_reference(x, w1, b1, w2, b2)
    assert out.shape == (N, 1)
    assert jnp.allclose(out, ref, atol=1e-5, rtol=1e-5)

    print("KERNEL_OK")
</pallas_src>

<mosaic_0001>
module attributes {stable_mosaic.version = 11 : i64} {
  func.func @mlp_kernel(%arg0: i32, %arg1: memref<1x128xf32, #tpu.memory_space<vmem>>, %arg2: memref<16x1xf32, #tpu.memory_space<vmem>>, %arg3: memref<16x1xf32, #tpu.memory_space<vmem>>, %arg4: memref<16x1xf32, #tpu.memory_space<vmem>>, %arg5: memref<1x1xf32, #tpu.memory_space<smem>>, %arg6: memref<1x128xf32, #tpu.memory_space<vmem>>) attributes {dimension_semantics = [#tpu.dimension_semantics<parallel>], iteration_bounds = array<i64: 1>, scalar_prefetch = 0 : i64, scratch_operands = 0 : i64, tpu.core_type = #tpu.core_type<tc>, window_params = [{transform_indices = @transform_0, window_bounds = array<i64: 1, 128>}, {pipeline_mode = #tpu.pipeline_mode<synchronous>, transform_indices = @transform_1, window_bounds = array<i64: 16, 1>}, {pipeline_mode = #tpu.pipeline_mode<synchronous>, transform_indices = @transform_2, window_bounds = array<i64: 16, 1>}, {pipeline_mode = #tpu.pipeline_mode<synchronous>, transform_indices = @transform_3, window_bounds = array<i64: 16, 1>}, {transform_indices = @transform_4, window_bounds = array<i64: 1, 1>}, {transform_indices = @transform_5, window_bounds = array<i64: 1, 128>}]} {
    %c0 = arith.constant 0 : index
    %c0_0 = arith.constant 0 : index
    %0 = vector.load %arg1[%c0, %c0_0] : memref<1x128xf32, #tpu.memory_space<vmem>>, vector<1x128xf32>
    %c0_1 = arith.constant 0 : index
    %c0_2 = arith.constant 0 : index
    %1 = vector.load %arg2[%c0_1, %c0_2] : memref<16x1xf32, #tpu.memory_space<vmem>>, vector<16x1xf32>
    %2 = vector.broadcast %1 : vector<16x1xf32> to vector<16x128xf32>
    %3 = vector.broadcast %0 : vector<1x128xf32> to vector<16x128xf32>
    %4 = arith.mulf %2, %3 : vector<16x128xf32>
    %c0_3 = arith.constant 0 : index
    %c0_4 = arith.constant 0 : index
    %5 = vector.load %arg3[%c0_3, %c0_4] : memref<16x1xf32, #tpu.memory_space<vmem>>, vector<16x1xf32>
    %6 = vector.broadcast %5 : vector<16x1xf32> to vector<16x128xf32>
    %7 = arith.addf %4, %6 : vector<16x128xf32>
    %8 = math.tanh %7 : vector<16x128xf32>
    %c0_5 = arith.constant 0 : index
    %c0_6 = arith.constant 0 : index
    %9 = vector.load %arg4[%c0_5, %c0_6] : memref<16x1xf32, #tpu.memory_space<vmem>>, vector<16x1xf32>
    %10 = vector.broadcast %9 : vector<16x1xf32> to vector<16x128xf32>
    %11 = arith.mulf %8, %10 : vector<16x128xf32>
    %cst = arith.constant dense<0.000000e+00> : vector<128xf32>
    %12 = vector.multi_reduction <add>, %11, %cst [0] : vector<16x128xf32> to vector<128xf32>
    %13 = vector.shape_cast %12 : vector<128xf32> to vector<1x128xf32>
    %c0_7 = arith.constant 0 : index
    %c0_8 = arith.constant 0 : index
    %14 = memref.load %arg5[%c0_7, %c0_8] : memref<1x1xf32, #tpu.memory_space<smem>>
    %15 = vector.broadcast %14 : f32 to vector<1x128xf32>
    %16 = arith.addf %13, %15 : vector<1x128xf32>
    %c0_9 = arith.constant 0 : index
    %c0_10 = arith.constant 0 : index
    %17 = vector.load %arg6[%c0_9, %c0_10] : memref<1x128xf32, #tpu.memory_space<vmem>>, vector<1x128xf32>
    tpu.vector_store %arg6[%c0_9, %c0_10], %16 {strides = array<i32>} : memref<1x128xf32, #tpu.memory_space<vmem>>, vector<1x128xf32>,
    return
  }
  func.func @transform_0(%arg0: i32) -> (i32, i32) {
    %c0_i32 = arith.constant 0 : i32
    %c0_i32_0 = arith.constant 0 : i32
    return %c0_i32, %arg0 : i32, i32
  }
  func.func @transform_1(%arg0: i32) -> (i32, i32) {
    %c0_i32 = arith.constant 0 : i32
    %c0_i32_0 = arith.constant 0 : i32
    %c0_i32_1 = arith.constant 0 : i32
    return %c0_i32, %c0_i32_0 : i32, i32
  }
  func.func @transform_2(%arg0: i32) -> (i32, i32) {
    %c0_i32 = arith.constant 0 : i32
    %c0_i32_0 = arith.constant 0 : i32
    %c0_i32_1 = arith.constant 0 : i32
    return %c0_i32, %c0_i32_0 : i32, i32
  }
  func.func @transform_3(%arg0: i32) -> (i32, i32) {
    %c0_i32 = arith.constant 0 : i32
    %c0_i32_0 = arith.constant 0 : i32
    %c0_i32_1 = arith.constant 0 : i32
    return %c0_i32, %c0_i32_0 : i32, i32
  }
  func.func @transform_4(%arg0: i32) -> (i32, i32) {
    %c0_i32 = arith.constant 0 : i32
    %c0_i32_0 = arith.constant 0 : i32
    %c0_i32_1 = arith.constant 0 : i32
    return %c0_i32, %c0_i32_0 : i32, i32
  }
  func.func @transform_5(%arg0: i32) -> (i32, i32) {
    %c0_i32 = arith.constant 0 : i32
    %c0_i32_0 = arith.constant 0 : i32
    return %c0_i32, %arg0 : i32, i32
  }
}

</mosaic_0001>

<bundles_post_ra>
// kernel: tpu_custom_call.1
= control target key start
LH: loop header
LB: loop body
LE: loop exit
PB: predicated region body
PF: predicated region fallthrough
CT: control target
= control target key end

     0   :  { %v129_v2 = vmov 0   ;;  %s188_s0 = inlined_call_operand.vmem [shape: f32[1,128], index: 0, kind: input, shape index: {}]   ;;  %s189_s1 = inlined_call_operand.vmem [shape: f32[16,1], index: 1, kind: input, shape index: {}]   ;;  %s190_s2 = inlined_call_operand.vmem [shape: f32[16,1], index: 2, kind: input, shape index: {}]   ;;  %s191_s3 = inlined_call_operand.vmem [shape: f32[16,1], index: 3, kind: input, shape index: {}]   ;;  %s192_s4 = inlined_call_operand.<no memory space> [shape: f32[1,1], index: 4, kind: input, shape index: {}]   ;;  %s193_s5 = inlined_call_operand.hbm [shape: f32[1,128], index: 5, kind: output, shape index: {}]  }
   0x1   :  { %v43_v0 = vld [vmem:[%s190_s2] sm:$0xff]  ;;  %102 = vset.pattern.permute.xlu1 %v129_v2  ;;  %101 = vset.pattern.permute.xlu0 %v129_v2 }
   0x2   :  { %v23_v1 = vld [vmem:[%s189_s1] sm:$0xff]  ;;  %47 = vperm.xlu1 %102, %v43_v0  }
   0x3   :  { %27 = vperm.xlu0 %101, %v23_v1  }
   0x4   :  { %11 = vsyncpa [#allocation4], 0  ;;  %v44_v3 = vld [vmem:[%s190_s2 + $0x8] sm:$0xff]  ;;  %v59_v6 = vld [vmem:[%s191_s3] sm:$0xff]  ;;  %v81_v28 = vstv %s192_s4  ;;  %s130_s2 = smov [#allocation3]  }
   0x5   :  { %v24_v4 = vld [vmem:[%s189_s1 + $0x8] sm:$0xff]  ;;  %v98_v7 = vld [vmem:[%s188_s0] ss:$0 sm:$0xff] }
   0x6   :  { %52 = vperm.xlu1 %102, %v44_v3   ;;  %v60_v5 = vld [vmem:[%s191_s3 + $0x8] sm:$0xff]  ;;  %s90_s3 = sshll.u32 %s130_s2, 4  ;;  %s91_s3 = int_to_ptr.vmem [resolvable:$true] %s90_s3 }
   0x7   :  { %32 = vperm.xlu0 %101, %v24_v4   ;;  %s107_s7 = scalar_lea.vmem %s91_s3, 16  ;;  %s111_s8 = scalar_lea.vmem %s91_s3, 32 }
   0x8   :  { %p108_p0 = scmp.ne.s32.totalorder %s91_s3, %s107_s7  ;;  %p112_p1 = scmp.lt.s32.totalorder %s91_s3, %s91_s3 }
   0x9   :  { %p113_p2 = scmp.lt.s32.totalorder %s111_s8, %s107_s7 }
   0xa   :  { %68 = vperm.xlu1 %102, %v60_v5  }
   0xb   :  { %63 = vperm.xlu0 %101, %v59_v6   ;;  %p114_p3 = por %p113_p2, %p112_p1 }
   0xd   :  { %p115_p4 = pnand %p114_p3, %p108_p0 }
  0x7d   :  { %v48_v8 = vpop.permute.xlu1 %47 }
  0x7e   :  { %v28_v9 = vpop.permute.xlu0 %27 }
  0x7f   :  { %v41_v10 = vmul.f32 %v98_v7, %v28_v9 }
  0x81   :  { %v55_v11 = vadd.f32 %v48_v8, %v41_v10  ;;  %v53_v14 = vpop.permute.xlu1 %52 }
  0x82   :  { %v33_v12 = vpop.permute.xlu0 %32 }
  0x83   :  { %v42_v13 = vmul.f32 %v98_v7, %v33_v12  ;;  %103 = vtanh.f32 %v55_v11 }
  0x85   :  { %v56_v15 = vadd.f32 %v53_v14, %v42_v13  ;;  %v69_v18 = vpop.permute.xlu1 %68 }
  0x86   :  { %v64_v19 = vpop.permute.xlu0 %63 }
  0x87   :  { %105 = vtanh.f32 %v56_v15 }
  0x90   :  { %v104_v16 = vpop.eup %103 }
  0x91   :  { %v71_v21 = vmul.f32 %v104_v16, %v64_v19 }
  0x94   :  { %v106_v17 = vpop.eup %105 }
  0x95   :  { %v72_v20 = vmul.f32 %v106_v17, %v69_v18 }
  0x97   :  { %v73_v22 = vadd.f32 %v72_v20, %v71_v21 }
  0x99   :  { %v74_v23 = vrot.slane %v73_v22, 4 }
  0x9b   :  { %v75_v24 = vadd.f32 %v74_v23, %v73_v22 }
  0x9d   :  { %v76_v25 = vrot.slane %v75_v24, 2 }
  0x9f   :  { %v77_v26 = vadd.f32 %v76_v25, %v75_v24 }
  0xa1   :  { %v78_v27 = vrot.slane %v77_v26, 1 }
  0xa3   :  { %v79_v29 = vadd.f32 %v78_v27, %v77_v26 }
  0xa5   :  { %v82_v30 = vadd.f32 %v81_v28, %v79_v29 }
  0xa7   :  { %83 = vst [vmem:[#allocation3] sm:$0x1] %v82_v30 }
  0xa8   :  { %118 = shalt.err (!%p115_p4)
}
  0xa9   :  { %93 = dma.vmem_to_hbm [thread:$0]  %s91_s3, 16, %s193_s5, [#allocation4]  }
  0xaa   :  { %127 = dma.done.wait [#allocation4], 16  }
  0xab   :  { %128 = vsyncadd [#allocation4], 4294967280 }
  0xac   :  { %97 = vsyncpa [#allocation4], 1 }

</bundles_post_ra>
